<compile_context>
chip_gen: v6e
topology: v6e:2x2x1
jax: 0.10.0
libtpu: 0.0.40
codegen_flags: <defaults>
</compile_context>

<pallas_src>
import functools
import math

import jax
import jax.numpy as jnp
from jax.experimental import pallas as pl
from jax.experimental.pallas import tpu as pltpu


# Conservative scoped-VMEM budget, safe across v5e/v6e (32 MiB default scoped)
# and v7x (64 MiB physical VMEM).
_VMEM_BUDGET = 32 * 1024 * 1024


def _pick_row_tile(m, row_bytes, resident_bytes):
    """Largest row tile whose double-buffered input/output tiles plus the
    resident weights fit the VMEM budget. Row tiles are either the full M
    (always a legal block dim) or a multiple of 8."""
    if m <= 512:
        return m
    avail = max(_VMEM_BUDGET - resident_bytes, 16 * row_bytes)
    tm = min(1024, avail // (2 * row_bytes))
    tm = max(8, (tm // 8) * 8)
    return min(tm, m)


# ----------------------------------------------------------------------------
# Kernel 1: row-tiled matmul + bias (qkv projection)
# ----------------------------------------------------------------------------
def _matmul_bias_kernel(x_ref, w_ref, b_ref, o_ref):
    # Operands stay in their native dtype (bf16 would feed the fast MXU path);
    # accumulation forced to f32 via preferred_element_type.
    y = jnp.dot(x_ref[...], w_ref[...], preferred_element_type=jnp.float32)
    y = y + b_ref[...].astype(jnp.float32)
    o_ref[...] = y.astype(o_ref.dtype)


def _linear(x2, w, b):
    m, k = x2.shape
    n = w.shape[1]
    itemsize = x2.dtype.itemsize
    tm = _pick_row_tile(m, row_bytes=(k + n) * itemsize,
                        resident_bytes=(k * n + n) * itemsize)
    cost = pl.CostEstimate(
        flops=2 * m * k * n,
        transcendentals=0,
        bytes_accessed=(m * k + k * n + n + m * n) * itemsize,
    )
    return pl.pallas_call(
        _matmul_bias_kernel,
        out_shape=jax.ShapeDtypeStruct((m, n), x2.dtype),
        grid_spec=pltpu.PrefetchScalarGridSpec(
            num_scalar_prefetch=0,
            grid=(pl.cdiv(m, tm),),
            in_specs=[
                pl.BlockSpec((tm, k), lambda i: (i, 0)),   # x tile (pipelined)
                pl.BlockSpec((k, n), lambda i: (0, 0)),    # W resident
                pl.BlockSpec((1, n), lambda i: (0, 0)),    # bias resident
            ],
            out_specs=pl.BlockSpec((tm, n), lambda i: (i, 0)),
        ),
        compiler_params=pltpu.CompilerParams(
            dimension_semantics=("parallel",)),
        cost_estimate=cost,
    )(x2, w, b.reshape(1, n))


# ----------------------------------------------------------------------------
# Kernel 2: per-batch fused attention over all heads
# ----------------------------------------------------------------------------
def _attention_kernel(q_ref, k_ref, v_ref, mask_ref, o_ref, *, scale):
    q = q_ref[0]                       # [H, T, hs]
    k = k_ref[0]
    v = v_ref[0]
    # Scores for all heads at once (batched MXU matmul), f32 accumulation.
    s = jnp.einsum("htd,hsd->hts", q, k,
                   preferred_element_type=jnp.float32) * scale
    # TODO(synk): nn.Dropout(p=0.1) on the raw scores is a no-op in eval mode.
    key_mask = mask_ref[...]           # [1, 1, T]; 0 => masked key
    s = jnp.where(key_mask == 0, -jnp.inf, s)
    # Numerically-stable softmax over keys.
    m = jnp.max(s, axis=-1, keepdims=True)
    p = jnp.exp(s - m)
    l = jnp.sum(p, axis=-1, keepdims=True)
    p = p / l
    o = jnp.einsum("hts,hsd->htd", p.astype(v.dtype), v,
                   preferred_element_type=jnp.float32)
    o_ref[0] = o.astype(o_ref.dtype)


def _attention(q, k, v, mask3, *, scale):
    b, h, t, hs = q.shape
    itemsize = q.dtype.itemsize
    cost = pl.CostEstimate(
        flops=4 * b * h * t * t * hs,
        transcendentals=b * h * t * t,
        bytes_accessed=4 * b * h * t * hs * itemsize + mask3.size * 4,
    )
    return pl.pallas_call(
        functools.partial(_attention_kernel, scale=scale),
        out_shape=jax.ShapeDtypeStruct((b, h, t, hs), q.dtype),
        grid_spec=pltpu.PrefetchScalarGridSpec(
            num_scalar_prefetch=0,
            grid=(b,),
            in_specs=[
                pl.BlockSpec((1, h, t, hs), lambda i: (i, 0, 0, 0)),
                pl.BlockSpec((1, h, t, hs), lambda i: (i, 0, 0, 0)),
                pl.BlockSpec((1, h, t, hs), lambda i: (i, 0, 0, 0)),
                pl.BlockSpec((1, 1, t), lambda i: (i, 0, 0)),
            ],
            out_specs=pl.BlockSpec((1, h, t, hs), lambda i: (i, 0, 0, 0)),
        ),
        compiler_params=pltpu.CompilerParams(
            dimension_semantics=("parallel",)),
        cost_estimate=cost,
    )(q, k, v, mask3)


# ----------------------------------------------------------------------------
# Kernel 3: fused out + adjust_dim projections
# ----------------------------------------------------------------------------
def _out_adjust_kernel(a_ref, w1_ref, b1_ref, w2_ref, b2_ref, o_ref):
    hmid = jnp.dot(a_ref[...], w1_ref[...], preferred_element_type=jnp.float32)
    hmid = (hmid + b1_ref[...].astype(jnp.float32)).astype(a_ref.dtype)
    y = jnp.dot(hmid, w2_ref[...], preferred_element_type=jnp.float32)
    y = y + b2_ref[...].astype(jnp.float32)
    o_ref[...] = y.astype(o_ref.dtype)


def _out_adjust(a2, w1, b1, w2, b2):
    m, d = a2.shape
    e = w1.shape[1]
    f = w2.shape[1]
    itemsize = a2.dtype.itemsize
    tm = _pick_row_tile(
        m,
        row_bytes=(d + f) * itemsize,
        resident_bytes=(d * e + e + e * f + f) * itemsize,
    )
    cost = pl.CostEstimate(
        flops=2 * m * d * e + 2 * m * e * f,
        transcendentals=0,
        bytes_accessed=(m * d + d * e + e + e * f + f + m * f) * itemsize,
    )
    return pl.pallas_call(
        _out_adjust_kernel,
        out_shape=jax.ShapeDtypeStruct((m, f), a2.dtype),
        grid_spec=pltpu.PrefetchScalarGridSpec(
            num_scalar_prefetch=0,
            grid=(pl.cdiv(m, tm),),
            in_specs=[
                pl.BlockSpec((tm, d), lambda i: (i, 0)),   # attn rows (pipelined)
                pl.BlockSpec((d, e), lambda i: (0, 0)),    # W_out resident
                pl.BlockSpec((1, e), lambda i: (0, 0)),
                pl.BlockSpec((e, f), lambda i: (0, 0)),    # W_adjust resident
                pl.BlockSpec((1, f), lambda i: (0, 0)),
            ],
            out_specs=pl.BlockSpec((tm, f), lambda i: (i, 0)),
        ),
        compiler_params=pltpu.CompilerParams(
            dimension_semantics=("parallel",)),
        cost_estimate=cost,
    )(a2, w1, b1.reshape(1, e), w2, b2.reshape(1, f))


# ----------------------------------------------------------------------------
# Full forward
# ----------------------------------------------------------------------------
def rwkv_tiny_attn_forward(x, mask, params):
    w_qkv, b_qkv = params["qkv"]
    w_out, b_out = params["out"]
    w_adj, b_adj = params["adjust_dim"]
    n_head = params["n_head"]

    bsz, t, c = x.shape
    d_attn = w_qkv.shape[1] // 3
    head_size = d_attn // n_head
    m = bsz * t

    qkv = _linear(x.reshape(m, c), w_qkv, b_qkv).reshape(bsz, t, 3 * d_attn)
    q, k, v = jnp.split(qkv, 3, axis=-1)

    def to_heads(u):
        return u.reshape(bsz, t, n_head, head_size).transpose(0, 2, 1, 3)

    q, k, v = to_heads(q), to_heads(k), to_heads(v)          # [B, H, T, hs]
    mask3 = mask.astype(jnp.int32).reshape(bsz, 1, t)

    o = _attention(q, k, v, mask3, scale=1.0 / math.sqrt(head_size))
    o = o.transpose(0, 2, 1, 3).reshape(m, d_attn)

    out = _out_adjust(o, w_out, b_out, w_adj, b_adj)
    return out.reshape(bsz, t, w_adj.shape[1])


def _reference(x, mask, params):
    w_qkv, b_qkv = params["qkv"]
    w_out, b_out = params["out"]
    w_adj, b_adj = params["adjust_dim"]
    n_head = params["n_head"]
    bsz, t, _ = x.shape
    d_attn = w_qkv.shape[1] // 3
    hs = d_attn // n_head

    qkv = x @ w_qkv + b_qkv
    q, k, v = jnp.split(qkv, 3, axis=-1)

    def to_heads(u):
        return u.reshape(bsz, t, n_head, hs).transpose(0, 2, 1, 3)

    q, k, v = to_heads(q), to_heads(k), to_heads(v)
    s = jnp.einsum("bhtd,bhsd->bhts", q, k) / math.sqrt(hs)
    s = jnp.where(mask[:, None, None, :] == 0, -jnp.inf, s)
    p = jax.nn.softmax(s, axis=-1)
    o = jnp.einsum("bhts,bhsd->bhtd", p, v)
    o = o.transpose(0, 2, 1, 3).reshape(bsz, t, d_attn)
    return (o @ w_out + b_out) @ w_adj + b_adj


if __name__ == "__main__":
    key = jax.random.PRNGKey(0)
    keys = jax.random.split(key, 7)

    # net params: n_embd=32, rwkv_tiny_attn (d_attn)=32, rwkv_tiny_head=4.
    n_embd, d_attn, n_head = 32, 32, 4
    bsz, t = 2, 8
    c = n_embd // 2                    # qkv takes n_embd // 2 input features

    x = jax.random.normal(keys[0], (bsz, t, c), dtype=jnp.float32)
    mask = jnp.ones((bsz, t), dtype=jnp.int32).at[1, 6:].set(0)

    def linear_params(kw, kb, fan_in, fan_out):
        w = jax.random.normal(kw, (fan_in, fan_out), jnp.float32) / math.sqrt(fan_in)
        b = jax.random.normal(kb, (fan_out,), jnp.float32) * 0.01
        return w, b

    params = {
        "qkv": linear_params(keys[1], keys[2], c, 3 * d_attn),
        "out": linear_params(keys[3], keys[4], d_attn, n_embd),
        "adjust_dim": linear_params(keys[5], keys[6], n_embd, 64),
        "n_head": n_head,
    }

    out = rwkv_tiny_attn_forward(x, mask, params)
    jax.block_until_ready(out)

    ref = _reference(x, mask, params)
    assert out.shape == (bsz, t, 64)
    assert jnp.allclose(out, ref, atol=1e-4, rtol=1e-4), float(
        jnp.max(jnp.abs(out - ref)))

    print("KERNEL_OK")
</pallas_src>

<mosaic_0001>
module attributes {stable_mosaic.version = 11 : i64} {
  func.func @_matmul_bias_kernel(%arg0: i32, %arg1: memref<16x16xf32, #tpu.memory_space<vmem>>, %arg2: memref<16x96xf32, #tpu.memory_space<vmem>>, %arg3: memref<1x96xf32, #tpu.memory_space<vmem>>, %arg4: memref<16x96xf32, #tpu.memory_space<vmem>>) attributes {dimension_semantics = [#tpu.dimension_semantics<parallel>], iteration_bounds = array<i64: 1>, scalar_prefetch = 0 : i64, scratch_operands = 0 : i64, tpu.core_type = #tpu.core_type<tc>, window_params = [{transform_indices = @transform_0, window_bounds = array<i64: 16, 16>}, {pipeline_mode = #tpu.pipeline_mode<synchronous>, transform_indices = @transform_1, window_bounds = array<i64: 16, 96>}, {pipeline_mode = #tpu.pipeline_mode<synchronous>, transform_indices = @transform_2, window_bounds = array<i64: 1, 96>}, {transform_indices = @transform_3, window_bounds = array<i64: 16, 96>}]} {
    %c0 = arith.constant 0 : index
    %c0_0 = arith.constant 0 : index
    %0 = vector.load %arg1[%c0, %c0_0] : memref<16x16xf32, #tpu.memory_space<vmem>>, vector<16x16xf32>
    %c0_1 = arith.constant 0 : index
    %c0_2 = arith.constant 0 : index
    %1 = vector.load %arg2[%c0_1, %c0_2] : memref<16x96xf32, #tpu.memory_space<vmem>>, vector<16x96xf32>
    %cst = arith.constant dense<0.000000e+00> : vector<16x96xf32>
    %2 = tpu.matmul %0, %1, %cst {dimension_numbers = #tpu.dot_dimension_numbers<[1], [0], [0], [1], [0, 0, 1, 1], [], []>} : vector<16x16xf32>, vector<16x96xf32>, vector<16x96xf32> -> vector<16x96xf32>
    %c0_3 = arith.constant 0 : index
    %c0_4 = arith.constant 0 : index
    %3 = vector.load %arg3[%c0_3, %c0_4] : memref<1x96xf32, #tpu.memory_space<vmem>>, vector<1x96xf32>
    %4 = vector.broadcast %3 : vector<1x96xf32> to vector<16x96xf32>
    %5 = arith.addf %2, %4 : vector<16x96xf32>
    %c0_5 = arith.constant 0 : index
    %c0_6 = arith.constant 0 : index
    %6 = vector.load %arg4[%c0_5, %c0_6] : memref<16x96xf32, #tpu.memory_space<vmem>>, vector<16x96xf32>
    tpu.vector_store %arg4[%c0_5, %c0_6], %5 {strides = array<i32>} : memref<16x96xf32, #tpu.memory_space<vmem>>, vector<16x96xf32>,
    return
  }
  func.func @transform_0(%arg0: i32) -> (i32, i32) {
    %c0_i32 = arith.constant 0 : i32
    %c0_i32_0 = arith.constant 0 : i32
    return %arg0, %c0_i32 : i32, i32
  }
  func.func @transform_1(%arg0: i32) -> (i32, i32) {
    %c0_i32 = arith.constant 0 : i32
    %c0_i32_0 = arith.constant 0 : i32
    %c0_i32_1 = arith.constant 0 : i32
    return %c0_i32, %c0_i32_0 : i32, i32
  }
  func.func @transform_2(%arg0: i32) -> (i32, i32) {
    %c0_i32 = arith.constant 0 : i32
    %c0_i32_0 = arith.constant 0 : i32
    %c0_i32_1 = arith.constant 0 : i32
    return %c0_i32, %c0_i32_0 : i32, i32
  }
  func.func @transform_3(%arg0: i32) -> (i32, i32) {
    %c0_i32 = arith.constant 0 : i32
    %c0_i32_0 = arith.constant 0 : i32
    return %arg0, %c0_i32 : i32, i32
  }
}

</mosaic_0001>

<bundles_post_ra>
// kernel: tpu_custom_call.1
= control target key start
LH: loop header
LB: loop body
LE: loop exit
PB: predicated region body
PF: predicated region fallthrough
CT: control target
= control target key end

     0   :  { %8 = vsyncpa [#allocation3], 0  ;;  %s288_s0 = inlined_call_operand.hbm [shape: f32[16,16], index: 0, kind: input, shape index: {}]   ;;  %s289_s1 = inlined_call_operand.hbm [shape: f32[16,96], index: 1, kind: input, shape index: {}]   ;;  %s290_s2 = inlined_call_operand.vmem [shape: f32[1,96], index: 2, kind: input, shape index: {}]   ;;  %s291_s3 = inlined_call_operand.hbm [shape: f32[16,96], index: 3, kind: output, shape index: {}]  }
   0x1   :  { %9 = vsyncpa [#allocation6], 0 }
   0x2   :  { %10 = vsyncpa [#allocation4], 0  ;;  %s242_s12 = smov [#allocation2]  }
   0x3   :  { %s16_s13 = sshll.u32 %s242_s12, 4  ;;  %s17_s13 = int_to_ptr.vmem [resolvable:$true] %s16_s13 }
   0x4   :  { %s184_s14 = scalar_lea.vmem %s17_s13, 256  ;;  %p189_p1 = scmp.lt.s32.totalorder %s17_s13, %s17_s13 }
   0x5   :  { %p185_p0 = scmp.ne.s32.totalorder %s17_s13, %s184_s14  ;;  %p190_p2 = scmp.lt.s32.totalorder %s184_s14, %s184_s14 }
   0x7   :  { %p191_p3 = por %p190_p2, %p189_p1 }
   0x9   :  { %p192_p4 = pnand %p191_p3, %p185_p0 }
   0xb   :  { %195 = shalt.err (!%p192_p4)
}
   0xc   :  { %s243_s15 = smov 128   ;;  %s244_s16 = smov 8  }
   0xd   :  { %22 = dma.hbm_to_vmem [thread:$0]  %s288_s0, 256, %s17_s13, [#allocation3], %s243_s15, %s243_s15, %s244_s16  }
   0xe   :  { %s245_s19 = smov [#allocation5]  }
   0xf   :  { %s28_s20 = sshll.u32 %s245_s19, 4  ;;  %s29_s20 = int_to_ptr.vmem [resolvable:$true] %s28_s20 }
  0x10   :  { %s204_s21 = scalar_lea.vmem %s29_s20, 256  ;;  %p209_p6 = scmp.lt.s32.totalorder %s29_s20, %s29_s20 }
  0x11   :  { %p205_p5 = scmp.ne.s32.totalorder %s29_s20, %s204_s21  ;;  %p210_p7 = scmp.lt.s32.totalorder %s204_s21, %s204_s21 }
  0x13   :  { %p211_p8 = por %p210_p7, %p209_p6 }
  0x15   :  { %p212_p9 = pnand %p211_p8, %p205_p5 }
  0x17   :  { %215 = shalt.err (!%p212_p9)
}
  0x18   :  { %34 = dma.hbm_to_vmem [thread:$0]  %s289_s1, 256, %s29_s20, [#allocation6], %s243_s15, %s243_s15, %s244_s16  }
  0x19   :  { %236 = dma.done.wait [#allocation3], 256  }
  0x1a   :  { %237 = vsyncadd [#allocation3], 4294967040 }
  0x1b   :  { %238 = dma.done.wait [#allocation6], 256  }
  0x1c   :  { %239 = vsyncadd [#allocation6], 4294967040  ;;  %vm54_vm0 = vcmask 130048   ;;  %v46_v0 = vld [vmem:[#allocation5 + $0x8] sm:$0xff]  ;;  %v45_v1 = vld [vmem:[#allocation5] sm:$0xff]  ;;  %vm136_vm1 = vcmask 785408  }
  0x1d   :  { %v43_v2 = vld [vmem:[#allocation2] sm:$0xff]  ;;  %164 = vmatprep.subr.mxu0 %v46_v0  ;;  %v44_v3 = vld [vmem:[#allocation2 + $0x8] sm:$0xff]  ;;  %s246_s1 = smov [#allocation7]  }
  0x1e   :  { %168 = vmatprep.mubr.msk.f32.mxu0 %vm54_vm0, %v43_v2  ;;  %165 = vmatpush3.msra.mxu0 %v46_v0  ;;  %v157_v4 = vld [vmem:[%s290_s2] ss:$0 sm:$0xff]  ;;  %s144_s25 = sshll.u32 %s246_s1, 4  ;;  %s145_s25 = int_to_ptr.vmem [resolvable:$true] %s144_s25 }
  0x1f   :  { %166 = vmatprep.subr.mxu0 %v45_v1  ;;  %s216_s26 = scalar_lea.vmem %s145_s25, 256  ;;  %p221_p11 = scmp.lt.s32.totalorder %s145_s25, %s145_s25 }
  0x20   :  { %167 = vmatpush3.msra.mxu0 %v45_v1  ;;  %p217_p10 = scmp.ne.s32.totalorder %s145_s25, %s216_s26  ;;  %p222_p12 = scmp.lt.s32.totalorder %s216_s26, %s216_s26 }
  0x21   :  { %169 = vmatmul.mubr.msk.f32.vlgmr.msra.gmra.mxu0 %vm54_vm0, %v44_v3 }
  0x22   :  { %p223_p13 = por %p222_p12, %p221_p11 }
  0x24   :  { %p224_p0 = pnand %p223_p13, %p217_p10 }
  0xe1   :  { %v170_v5 = vpop.f32.mrf.mxu0 }
  0xe2   :  { %v133_v6 = vadd.f32 %v170_v5, %v157_v4 }
  0xe3   :  { %v127_v7 = vpop.f32.mrf.mxu0 }
  0xe4   :  { %v128_v8 = vadd.f32 %v157_v4, %v127_v7  ;;  %138 = vst.msk [vmem:[#allocation7 + $0x8] sm:$0xff] %vm136_vm1, %v133_v6 }
  0xe6   :  { %137 = vst.msk [vmem:[#allocation7] sm:$0xff] %vm136_vm1, %v128_v8 }
  0xe7   :  { %227 = shalt.err (!%p224_p0)
}
  0xe8   :  { %150 = dma.vmem_to_hbm [thread:$0]  %s145_s25, 256, %s291_s3, [#allocation4], %s243_s15, %s243_s15, %s244_s16  }
  0xe9   :  { %240 = dma.done.wait [#allocation4], 256  }
  0xea   :  { %241 = vsyncadd [#allocation4], 4294967040 }
  0xeb   :  { %154 = vsyncpa [#allocation3], 1 }
  0xec   :  { %155 = vsyncpa [#allocation6], 1 }
  0xed   :  { %156 = vsyncpa [#allocation4], 1 }

</bundles_post_ra>
